<compile_context>
chip_gen: v6e
topology: v6e:2x2x1
jax: 0.10.0
libtpu: 0.0.40
codegen_flags: <defaults>
</compile_context>

<pallas_src>
import jax
import jax.numpy as jnp
from jax.experimental import pallas as pl
from jax.experimental.pallas import tpu as pltpu


# ---------------------------------------------------------------------------
# In-kernel math helpers
# ---------------------------------------------------------------------------
def _log_sigmoid(x):
    # Numerically stable log(sigmoid(x)) = min(x, 0) - log(1 + exp(-|x|)).
    return jnp.minimum(x, 0.0) - jnp.log(1.0 + jnp.exp(-jnp.abs(x)))


def _bce_with_logits_mean(logits, y):
    # nn.BCELoss(reduction='mean') applied to sigmoid(logits); PyTorch clamps
    # the log terms at -100.  mean-of-row-means == global mean here (all rows
    # have equal length).
    log_p = jnp.maximum(_log_sigmoid(logits), -100.0)
    log_1mp = jnp.maximum(_log_sigmoid(-logits), -100.0)
    bce = -(y * log_p + (1.0 - y) * log_1mp)
    return jnp.mean(jnp.mean(bce, axis=1, keepdims=True), axis=0, keepdims=True)


def _sigmoid(x):
    # Exact sigmoid; reciprocal (non-approx) keeps parity with torch.sigmoid.
    return pl.reciprocal(1.0 + jnp.exp(-x))


# ---------------------------------------------------------------------------
# Pallas kernels
# ---------------------------------------------------------------------------
def _early_fusion_concat_kernel(pooled_img_ref, pooled_txt_ref,
                                w_img_ref, b_img_ref, w_txt_ref, b_txt_ref,
                                w1a_img_ref, w1a_txt_ref, b1a_ref,
                                w1b_ref, b1b_ref, label_ref,
                                loss_ref, pred_ref, imgf_ref, txtf_ref):
    # Backbone projections (fused into the kernel).
    img_f = jnp.dot(pooled_img_ref[...], w_img_ref[...],
                    preferred_element_type=jnp.float32) + b_img_ref[...]
    txt_f = jnp.dot(pooled_txt_ref[...], w_txt_ref[...],
                    preferred_element_type=jnp.float32) + b_txt_ref[...]
    imgf_ref[...] = img_f
    txtf_ref[...] = txt_f

    # linear1 = Linear(2H, H) with the weight split along its input dim so the
    # (B, 2H) concat never materializes (no cross-lane relayout).
    h = (jnp.dot(img_f, w1a_img_ref[...], preferred_element_type=jnp.float32)
         + jnp.dot(txt_f, w1a_txt_ref[...], preferred_element_type=jnp.float32)
         + b1a_ref[...])
    h = jnp.maximum(h, 0.0)                                   # ReLU
    logits = jnp.dot(h, w1b_ref[...],
                     preferred_element_type=jnp.float32) + b1b_ref[...]

    pred = _sigmoid(logits)
    pred_ref[...] = pred
    loss_ref[...] = _bce_with_logits_mean(logits, label_ref[...])


def _early_fusion_add_kernel(pooled_img_ref, pooled_txt_ref,
                             w_img_ref, b_img_ref, w_txt_ref, b_txt_ref,
                             w2_ref, b2_ref, label_ref,
                             loss_ref, pred_ref, imgf_ref, txtf_ref):
    img_f = jnp.dot(pooled_img_ref[...], w_img_ref[...],
                    preferred_element_type=jnp.float32) + b_img_ref[...]
    txt_f = jnp.dot(pooled_txt_ref[...], w_txt_ref[...],
                    preferred_element_type=jnp.float32) + b_txt_ref[...]
    imgf_ref[...] = img_f
    txtf_ref[...] = txt_f

    fusion = img_f + txt_f                                    # add fusion
    logits = jnp.dot(fusion, w2_ref[...],
                     preferred_element_type=jnp.float32) + b2_ref[...]

    pred = _sigmoid(logits)
    pred_ref[...] = pred
    loss_ref[...] = _bce_with_logits_mean(logits, label_ref[...])


# ---------------------------------------------------------------------------
# Wrapper (glue: pooling / embedding gather stay in XLA; everything else is
# inside the Pallas kernel)
# ---------------------------------------------------------------------------
def early_fusion_forward(params, batch, option="concat"):
    # TODO(synk): Vgg/Resnet/Lstm/Gru backbones are not defined in the
    # reference module; deterministic pooled-linear stand-ins produce the
    # (B, hidden_dim) features.  The gather/pooling stays in XLA, the two
    # projection matmuls run inside the kernel.
    img = batch["image"]                                   # (B, C, H, W) NCHW
    pooled_img = jnp.mean(img, axis=(2, 3))                # (B, C)

    tokens = batch["text"]                                 # (B, S) int32
    emb = params["embedding"][tokens]                      # (B, S, word_dim)
    pooled_txt = jnp.mean(emb, axis=1)                     # (B, word_dim)

    labels = batch["label"].astype(jnp.float32)            # (B, L)
    B = pooled_img.shape[0]
    Hd = params["w_img"].shape[1]
    L = labels.shape[1]

    vmem = pl.BlockSpec(memory_space=pltpu.MemorySpace.VMEM)
    out_shapes = (
        jax.ShapeDtypeStruct((1, 1), jnp.float32),   # loss (scalar, as (1,1))
        jax.ShapeDtypeStruct((B, L), jnp.float32),   # sigmoid(logits)
        jax.ShapeDtypeStruct((B, Hd), jnp.float32),  # img_feature
        jax.ShapeDtypeStruct((B, Hd), jnp.float32),  # txt_feature
    )

    if option == "concat":
        # Split linear1's first weight: rows [:Hd] act on the image feature,
        # rows [Hd:] act on the text feature.
        w1a_img = params["w1a"][:Hd]
        w1a_txt = params["w1a"][Hd:]
        ins = (pooled_img, pooled_txt,
               params["w_img"], params["b_img"],
               params["w_txt"], params["b_txt"],
               w1a_img, w1a_txt, params["b1a"],
               params["w1b"], params["b1b"], labels)
        kernel = _early_fusion_concat_kernel
    else:
        ins = (pooled_img, pooled_txt,
               params["w_img"], params["b_img"],
               params["w_txt"], params["b_txt"],
               params["w2"], params["b2"], labels)
        kernel = _early_fusion_add_kernel

    loss, predict, img_feature, txt_feature = pl.pallas_call(
        kernel,
        out_shape=out_shapes,
        in_specs=[vmem] * len(ins),
        out_specs=(vmem,) * len(out_shapes),
    )(*ins)

    # fusion_feature is a pure re-arrangement of the two features — build it
    # outside the kernel (saves one output DMA / masked store inside).
    if option == "concat":
        fusion_feature = jnp.concatenate([img_feature, txt_feature], axis=1)
    else:
        fusion_feature = img_feature + txt_feature

    return {
        "loss": loss[0, 0],
        "logit": predict,
        "fusion_feature": fusion_feature,
        "img_feature": img_feature,
        "txt_feature": txt_feature,
    }


# ---------------------------------------------------------------------------
# Pure-JAX reference (for a numerical sanity check against the kernel)
# ---------------------------------------------------------------------------
def _reference_forward(params, batch, option="concat"):
    hi = jax.lax.Precision.HIGHEST
    pooled = jnp.mean(batch["image"], axis=(2, 3))
    img_f = jnp.dot(pooled, params["w_img"], precision=hi) + params["b_img"]
    emb = params["embedding"][batch["text"]]
    txt_pooled = jnp.mean(emb, axis=1)
    txt_f = jnp.dot(txt_pooled, params["w_txt"], precision=hi) + params["b_txt"]
    if option == "concat":
        fusion = jnp.concatenate([img_f, txt_f], axis=1)
        h = jnp.maximum(jnp.dot(fusion, params["w1a"], precision=hi)
                        + params["b1a"], 0.0)
        logits = jnp.dot(h, params["w1b"], precision=hi) + params["b1b"]
    else:
        fusion = img_f + txt_f
        logits = jnp.dot(fusion, params["w2"], precision=hi) + params["b2"]
    pred = 1.0 / (1.0 + jnp.exp(-logits))
    y = batch["label"].astype(jnp.float32)
    log_p = jnp.maximum(jnp.log(pred), -100.0)
    log_1mp = jnp.maximum(jnp.log(1.0 - pred), -100.0)
    loss = jnp.mean(-(y * log_p + (1.0 - y) * log_1mp))
    return {"loss": loss, "logit": pred, "fusion_feature": fusion,
            "img_feature": img_f, "txt_feature": txt_f}


# ---------------------------------------------------------------------------
# Deterministic parameter initialization (shapes follow the module __init__)
# ---------------------------------------------------------------------------
def init_params(key, channels, word_dim, vocab_size, hidden_dim, num_labels):
    ks = jax.random.split(key, 6)
    s = 0.05
    f32 = jnp.float32
    return {
        # image backbone stand-in
        "w_img": (jax.random.normal(ks[0], (channels, hidden_dim)) * s).astype(f32),
        "b_img": jnp.zeros((1, hidden_dim), f32),
        # text backbone stand-in
        "embedding": (jax.random.normal(ks[1], (vocab_size, word_dim)) * s).astype(f32),
        "w_txt": (jax.random.normal(ks[2], (word_dim, hidden_dim)) * s).astype(f32),
        "b_txt": jnp.zeros((1, hidden_dim), f32),
        # linear1 = Sequential(Linear(2H, H), ReLU, Linear(H, num_labels))
        "w1a": (jax.random.normal(ks[3], (2 * hidden_dim, hidden_dim)) * s).astype(f32),
        "b1a": jnp.zeros((1, hidden_dim), f32),
        "w1b": (jax.random.normal(ks[4], (hidden_dim, num_labels)) * s).astype(f32),
        "b1b": jnp.zeros((1, num_labels), f32),
        # linear2 = Linear(H, num_labels)  (used by option != 'concat')
        "w2": (jax.random.normal(ks[5], (hidden_dim, num_labels)) * s).astype(f32),
        "b2": jnp.zeros((1, num_labels), f32),
    }


if __name__ == "__main__":
    B, C, Hs, Ws = 2, 4, 16, 16          # batch, channels, spatial
    S, word_dim, vocab_size = 8, 16, 50  # seq length, word dim, vocab
    hidden_dim, num_labels = 32, 4

    key = jax.random.PRNGKey(0)
    k_img, k_txt, k_lbl, k_par = jax.random.split(key, 4)

    batch = {
        "image": jax.random.normal(k_img, (B, C, Hs, Ws), jnp.float32),
        "text": jax.random.randint(k_txt, (B, S), 0, vocab_size, jnp.int32),
        "label": jax.random.bernoulli(k_lbl, 0.5, (B, num_labels)).astype(jnp.float32),
    }
    params = init_params(k_par, C, word_dim, vocab_size, hidden_dim, num_labels)

    for option in ("concat", "add"):
        out = early_fusion_forward(params, batch, option=option)
        jax.block_until_ready(out)
        ref = _reference_forward(params, batch, option=option)

        fdim = 2 * hidden_dim if option == "concat" else hidden_dim
        assert out["logit"].shape == (B, num_labels)
        assert out["fusion_feature"].shape == (B, fdim)
        assert out["img_feature"].shape == (B, hidden_dim)
        assert out["txt_feature"].shape == (B, hidden_dim)

        for k in ("loss", "logit", "fusion_feature", "img_feature", "txt_feature"):
            assert jnp.allclose(out[k], ref[k], atol=1e-3, rtol=1e-3), (option, k)

    print("KERNEL_OK")
</pallas_src>

<mosaic_0001>
module attributes {stable_mosaic.version = 11 : i64} {
  func.func @_early_fusion_concat_kernel(%arg0: memref<2x4xf32, #tpu.memory_space<vmem>>, %arg1: memref<2x16xf32, #tpu.memory_space<vmem>>, %arg2: memref<4x32xf32, #tpu.memory_space<vmem>>, %arg3: memref<1x32xf32, #tpu.memory_space<vmem>>, %arg4: memref<16x32xf32, #tpu.memory_space<vmem>>, %arg5: memref<1x32xf32, #tpu.memory_space<vmem>>, %arg6: memref<32x32xf32, #tpu.memory_space<vmem>>, %arg7: memref<32x32xf32, #tpu.memory_space<vmem>>, %arg8: memref<1x32xf32, #tpu.memory_space<vmem>>, %arg9: memref<32x4xf32, #tpu.memory_space<vmem>>, %arg10: memref<1x4xf32, #tpu.memory_space<vmem>>, %arg11: memref<2x4xf32, #tpu.memory_space<vmem>>, %arg12: memref<1x1xf32, #tpu.memory_space<vmem>>, %arg13: memref<2x4xf32, #tpu.memory_space<vmem>>, %arg14: memref<2x32xf32, #tpu.memory_space<vmem>>, %arg15: memref<2x32xf32, #tpu.memory_space<vmem>>) attributes {dimension_semantics = [], scalar_prefetch = 0 : i64, scratch_operands = 0 : i64, tpu.core_type = #tpu.core_type<tc>} {
    %c0 = arith.constant 0 : index
    %c0_0 = arith.constant 0 : index
    %0 = vector.load %arg0[%c0, %c0_0] : memref<2x4xf32, #tpu.memory_space<vmem>>, vector<2x4xf32>
    %c0_1 = arith.constant 0 : index
    %c0_2 = arith.constant 0 : index
    %1 = vector.load %arg2[%c0_1, %c0_2] : memref<4x32xf32, #tpu.memory_space<vmem>>, vector<4x32xf32>
    %cst = arith.constant dense<0.000000e+00> : vector<2x32xf32>
    %2 = tpu.matmul %0, %1, %cst {dimension_numbers = #tpu.dot_dimension_numbers<[1], [0], [0], [1], [0, 0, 1, 1], [], []>} : vector<2x4xf32>, vector<4x32xf32>, vector<2x32xf32> -> vector<2x32xf32>
    %c0_3 = arith.constant 0 : index
    %c0_4 = arith.constant 0 : index
    %3 = vector.load %arg3[%c0_3, %c0_4] : memref<1x32xf32, #tpu.memory_space<vmem>>, vector<1x32xf32>
    %4 = vector.broadcast %3 : vector<1x32xf32> to vector<2x32xf32>
    %5 = arith.addf %2, %4 : vector<2x32xf32>
    %c0_5 = arith.constant 0 : index
    %c0_6 = arith.constant 0 : index
    %6 = vector.load %arg1[%c0_5, %c0_6] : memref<2x16xf32, #tpu.memory_space<vmem>>, vector<2x16xf32>
    %c0_7 = arith.constant 0 : index
    %c0_8 = arith.constant 0 : index
    %7 = vector.load %arg4[%c0_7, %c0_8] : memref<16x32xf32, #tpu.memory_space<vmem>>, vector<16x32xf32>
    %cst_9 = arith.constant dense<0.000000e+00> : vector<2x32xf32>
    %8 = tpu.matmul %6, %7, %cst_9 {dimension_numbers = #tpu.dot_dimension_numbers<[1], [0], [0], [1], [0, 0, 1, 1], [], []>} : vector<2x16xf32>, vector<16x32xf32>, vector<2x32xf32> -> vector<2x32xf32>
    %c0_10 = arith.constant 0 : index
    %c0_11 = arith.constant 0 : index
    %9 = vector.load %arg5[%c0_10, %c0_11] : memref<1x32xf32, #tpu.memory_space<vmem>>, vector<1x32xf32>
    %10 = vector.broadcast %9 : vector<1x32xf32> to vector<2x32xf32>
    %11 = arith.addf %8, %10 : vector<2x32xf32>
    %c0_12 = arith.constant 0 : index
    %c0_13 = arith.constant 0 : index
    %12 = vector.load %arg14[%c0_12, %c0_13] : memref<2x32xf32, #tpu.memory_space<vmem>>, vector<2x32xf32>
    tpu.vector_store %arg14[%c0_12, %c0_13], %5 {strides = array<i32>} : memref<2x32xf32, #tpu.memory_space<vmem>>, vector<2x32xf32>,
    %c0_14 = arith.constant 0 : index
    %c0_15 = arith.constant 0 : index
    %13 = vector.load %arg15[%c0_14, %c0_15] : memref<2x32xf32, #tpu.memory_space<vmem>>, vector<2x32xf32>
    tpu.vector_store %arg15[%c0_14, %c0_15], %11 {strides = array<i32>} : memref<2x32xf32, #tpu.memory_space<vmem>>, vector<2x32xf32>,
    %c0_16 = arith.constant 0 : index
    %c0_17 = arith.constant 0 : index
    %14 = vector.load %arg6[%c0_16, %c0_17] : memref<32x32xf32, #tpu.memory_space<vmem>>, vector<32x32xf32>
    %cst_18 = arith.constant dense<0.000000e+00> : vector<2x32xf32>
    %15 = tpu.matmul %5, %14, %cst_18 {dimension_numbers = #tpu.dot_dimension_numbers<[1], [0], [0], [1], [0, 0, 1, 1], [], []>} : vector<2x32xf32>, vector<32x32xf32>, vector<2x32xf32> -> vector<2x32xf32>
    %c0_19 = arith.constant 0 : index
    %c0_20 = arith.constant 0 : index
    %16 = vector.load %arg7[%c0_19, %c0_20] : memref<32x32xf32, #tpu.memory_space<vmem>>, vector<32x32xf32>
    %cst_21 = arith.constant dense<0.000000e+00> : vector<2x32xf32>
    %17 = tpu.matmul %11, %16, %cst_21 {dimension_numbers = #tpu.dot_dimension_numbers<[1], [0], [0], [1], [0, 0, 1, 1], [], []>} : vector<2x32xf32>, vector<32x32xf32>, vector<2x32xf32> -> vector<2x32xf32>
    %18 = arith.addf %15, %17 : vector<2x32xf32>
    %c0_22 = arith.constant 0 : index
    %c0_23 = arith.constant 0 : index
    %19 = vector.load %arg8[%c0_22, %c0_23] : memref<1x32xf32, #tpu.memory_space<vmem>>, vector<1x32xf32>
    %20 = vector.broadcast %19 : vector<1x32xf32> to vector<2x32xf32>
    %21 = arith.addf %18, %20 : vector<2x32xf32>
    %cst_24 = arith.constant 0.000000e+00 : f32
    %22 = vector.broadcast %cst_24 : f32 to vector<2x32xf32>
    %23 = arith.maximumf %21, %22 : vector<2x32xf32>
    %c0_25 = arith.constant 0 : index
    %c0_26 = arith.constant 0 : index
    %24 = vector.load %arg9[%c0_25, %c0_26] : memref<32x4xf32, #tpu.memory_space<vmem>>, vector<32x4xf32>
    %cst_27 = arith.constant dense<0.000000e+00> : vector<2x4xf32>
    %25 = tpu.matmul %23, %24, %cst_27 {dimension_numbers = #tpu.dot_dimension_numbers<[1], [0], [0], [1], [0, 0, 1, 1], [], []>} : vector<2x32xf32>, vector<32x4xf32>, vector<2x4xf32> -> vector<2x4xf32>
    %c0_28 = arith.constant 0 : index
    %c0_29 = arith.constant 0 : index
    %26 = vector.load %arg10[%c0_28, %c0_29] : memref<1x4xf32, #tpu.memory_space<vmem>>, vector<1x4xf32>
    %27 = vector.broadcast %26 : vector<1x4xf32> to vector<2x4xf32>
    %28 = arith.addf %25, %27 : vector<2x4xf32>
    %cst_30 = arith.constant 0.000000e+00 : f32
    %29 = vector.broadcast %cst_30 : f32 to vector<2x4xf32>
    %30 = arith.subf %29, %28 : vector<2x4xf32>
    %31 = math.exp %30 : vector<2x4xf32>
    %cst_31 = arith.constant 1.000000e+00 : f32
    %32 = vector.broadcast %cst_31 : f32 to vector<2x4xf32>
    %33 = arith.addf %32, %31 : vector<2x4xf32>
    %34 = tpu.reciprocal %33 : vector<2x4xf32> -> vector<2x4xf32>
    %c0_32 = arith.constant 0 : index
    %c0_33 = arith.constant 0 : index
    %35 = vector.load %arg13[%c0_32, %c0_33] : memref<2x4xf32, #tpu.memory_space<vmem>>, vector<2x4xf32>
    tpu.vector_store %arg13[%c0_32, %c0_33], %34 {strides = array<i32>} : memref<2x4xf32, #tpu.memory_space<vmem>>, vector<2x4xf32>,
    %c0_34 = arith.constant 0 : index
    %c0_35 = arith.constant 0 : index
    %36 = vector.load %arg11[%c0_34, %c0_35] : memref<2x4xf32, #tpu.memory_space<vmem>>, vector<2x4xf32>
    %cst_36 = arith.constant 0.000000e+00 : f32
    %37 = vector.broadcast %cst_36 : f32 to vector<2x4xf32>
    %38 = arith.minimumf %28, %37 : vector<2x4xf32>
    %39 = math.absf %28 : vector<2x4xf32>
    %cst_37 = arith.constant 0.000000e+00 : f32
    %40 = vector.broadcast %cst_37 : f32 to vector<2x4xf32>
    %41 = arith.subf %40, %39 : vector<2x4xf32>
    %42 = math.exp %41 : vector<2x4xf32>
    %cst_38 = arith.constant 1.000000e+00 : f32
    %43 = vector.broadcast %cst_38 : f32 to vector<2x4xf32>
    %44 = arith.addf %43, %42 : vector<2x4xf32>
    %45 = math.log %44 : vector<2x4xf32>
    %46 = arith.subf %38, %45 : vector<2x4xf32>
    %cst_39 = arith.constant -1.000000e+02 : f32
    %47 = vector.broadcast %cst_39 : f32 to vector<2x4xf32>
    %48 = arith.maximumf %46, %47 : vector<2x4xf32>
    %cst_40 = arith.constant 0.000000e+00 : f32
    %49 = vector.broadcast %cst_40 : f32 to vector<2x4xf32>
    %50 = arith.subf %49, %28 : vector<2x4xf32>
    %cst_41 = arith.constant 0.000000e+00 : f32
    %51 = vector.broadcast %cst_41 : f32 to vector<2x4xf32>
    %52 = arith.minimumf %50, %51 : vector<2x4xf32>
    %53 = math.absf %50 : vector<2x4xf32>
    %cst_42 = arith.constant 0.000000e+00 : f32
    %54 = vector.broadcast %cst_42 : f32 to vector<2x4xf32>
    %55 = arith.subf %54, %53 : vector<2x4xf32>
    %56 = math.exp %55 : vector<2x4xf32>
    %cst_43 = arith.constant 1.000000e+00 : f32
    %57 = vector.broadcast %cst_43 : f32 to vector<2x4xf32>
    %58 = arith.addf %57, %56 : vector<2x4xf32>
    %59 = math.log %58 : vector<2x4xf32>
    %60 = arith.subf %52, %59 : vector<2x4xf32>
    %cst_44 = arith.constant -1.000000e+02 : f32
    %61 = vector.broadcast %cst_44 : f32 to vector<2x4xf32>
    %62 = arith.maximumf %60, %61 : vector<2x4xf32>
    %63 = arith.mulf %36, %48 : vector<2x4xf32>
    %cst_45 = arith.constant 1.000000e+00 : f32
    %64 = vector.broadcast %cst_45 : f32 to vector<2x4xf32>
    %65 = arith.subf %64, %36 : vector<2x4xf32>
    %66 = arith.mulf %65, %62 : vector<2x4xf32>
    %67 = arith.addf %63, %66 : vector<2x4xf32>
    %cst_46 = arith.constant 0.000000e+00 : f32
    %68 = vector.broadcast %cst_46 : f32 to vector<2x4xf32>
    %69 = arith.subf %68, %67 : vector<2x4xf32>
    %cst_47 = arith.constant dense<0.000000e+00> : vector<2xf32>
    %70 = vector.multi_reduction <add>, %69, %cst_47 [1] : vector<2x4xf32> to vector<2xf32>
    %71 = vector.shape_cast %70 : vector<2xf32> to vector<2x1xf32>
    %cst_48 = arith.constant 4.000000e+00 : f32
    %72 = vector.broadcast %cst_48 : f32 to vector<2x1xf32>
    %73 = arith.divf %71, %72 : vector<2x1xf32>
    %cst_49 = arith.constant dense<0.000000e+00> : vector<1xf32>
    %74 = vector.multi_reduction <add>, %73, %cst_49 [0] : vector<2x1xf32> to vector<1xf32>
    %75 = vector.shape_cast %74 : vector<1xf32> to vector<1x1xf32>
    %cst_50 = arith.constant 2.000000e+00 : f32
    %76 = vector.broadcast %cst_50 : f32 to vector<1x1xf32>
    %77 = arith.divf %75, %76 : vector<1x1xf32>
    %c0_51 = arith.constant 0 : index
    %c0_52 = arith.constant 0 : index
    %78 = vector.load %arg12[%c0_51, %c0_52] : memref<1x1xf32, #tpu.memory_space<vmem>>, vector<1x1xf32>
    tpu.vector_store %arg12[%c0_51, %c0_52], %77 {strides = array<i32>} : memref<1x1xf32, #tpu.memory_space<vmem>>, vector<1x1xf32>,
    return
  }
}

</mosaic_0001>

<bundles_post_ra>
// kernel: tpu_custom_call.1
= control target key start
LH: loop header
LB: loop body
LE: loop exit
PB: predicated region body
PF: predicated region fallthrough
CT: control target
= control target key end

     0   :  { %21 = vsyncpa [#allocation3], 0  ;;  %s1018_s0 = inlined_call_operand.vmem [shape: f32[2,4], index: 0, kind: input, shape index: {}]   ;;  %s1019_s1 = inlined_call_operand.vmem [shape: f32[2,16], index: 1, kind: input, shape index: {}]   ;;  %s1020_s2 = inlined_call_operand.vmem [shape: f32[4,32], index: 2, kind: input, shape index: {}]   ;;  %s1021_s3 = inlined_call_operand.vmem [shape: f32[1,32], index: 3, kind: input, shape index: {}]   ;;  %s1022_s4 = inlined_call_operand.hbm [shape: f32[16,32], index: 4, kind: input, shape index: {}]   ;;  %s1023_s5 = inlined_call_operand.vmem [shape: f32[1,32], index: 5, kind: input, shape index: {}]   ;;  %s1024_s6 = inlined_call_operand.vmem [shape: f32[32,32], index: 6, kind: input, shape index: {}]   ;;  %s1025_s7 = inlined_call_operand.hbm [shape: f32[32,32], index: 7, kind: input, shape index: {}]   ;;  %s1026_s8 = inlined_call_operand.vmem [shape: f32[1,32], index: 8, kind: input, shape index: {}]   ;;  %s1027_s9 = inlined_call_operand.vmem [shape: f32[32,4], index: 9, kind: input, shape index: {}]   ;;  %s1028_s10 = inlined_call_operand.vmem [shape: f32[1,4], index: 10, kind: input, shape index: {}]   ;;  %s1029_s11 = inlined_call_operand.vmem [shape: f32[2,4], index: 11, kind: input, shape index: {}]   ;;  %s1030_s12 = inlined_call_operand.hbm [shape: f32[1,1], index: 12, kind: output, shape index: {0}]   ;;  %s1031_s13 = inlined_call_operand.hbm [shape: f32[2,4], index: 13, kind: output, shape index: {1}]   ;;  %s1032_s14 = inlined_call_operand.hbm [shape: f32[2,32], index: 14, kind: output, shape index: {2}]   ;;  %s1033_s15 = inlined_call_operand.hbm [shape: f32[2,32], index: 15, kind: output, shape index: {3}]  }
   0x1   :  { %22 = vsyncpa [#allocation6], 0 }
   0x2   :  { %23 = vsyncpa [#allocation4], 0 }
   0x3   :  { %24 = vsyncpa [#allocation9], 0 }
   0x4   :  { %25 = vsyncpa [#allocation12], 0  ;;  %s832_s18 = smov [#allocation2]  }
   0x5   :  { %s39_s19 = sshll.u32 %s832_s18, 4  ;;  %s40_s19 = int_to_ptr.vmem [resolvable:$true] %s39_s19 }
   0x6   :  { %s710_s20 = scalar_lea.vmem %s40_s19, 256  ;;  %p715_p1 = scmp.lt.s32.totalorder %s40_s19, %s40_s19 }
   0x7   :  { %p711_p0 = scmp.ne.s32.totalorder %s40_s19, %s710_s20  ;;  %p716_p2 = scmp.lt.s32.totalorder %s710_s20, %s710_s20 }
   0x9   :  { %p717_p3 = por %p716_p2, %p715_p1 }
   0xb   :  { %p718_p4 = pnand %p717_p3, %p711_p0 }
   0xd   :  { %721 = shalt.err (!%p718_p4)
}
   0xe   :  { %s833_s21 = smov 128   ;;  %s834_s22 = smov 8  }
   0xf   :  { %45 = dma.hbm_to_vmem [thread:$0]  %s1022_s4, 256, %s40_s19, [#allocation3], %s833_s21, %s833_s21, %s834_s22  }
  0x10   :  { %s835_s25 = smov [#allocation5]  }
  0x11   :  { %s55_s26 = sshll.u32 %s835_s25, 4  ;;  %s56_s26 = int_to_ptr.vmem [resolvable:$true] %s55_s26 }
  0x12   :  { %s730_s27 = scalar_lea.vmem %s56_s26, 512  ;;  %p735_p6 = scmp.lt.s32.totalorder %s56_s26, %s56_s26 }
  0x13   :  { %p731_p5 = scmp.ne.s32.totalorder %s56_s26, %s730_s27  ;;  %p736_p7 = scmp.lt.s32.totalorder %s730_s27, %s730_s27 }
  0x15   :  { %p737_p8 = por %p736_p7, %p735_p6 }
  0x17   :  { %p738_p9 = pnand %p737_p8, %p731_p5 }
  0x19   :  { %741 = shalt.err (!%p738_p9)
}
  0x1a   :  { %61 = dma.hbm_to_vmem [thread:$0]  %s1025_s7, 512, %s56_s26, [#allocation6], %s833_s21, %s833_s21, %s834_s22  }
  0x1b   :  { %822 = dma.done.wait [#allocation3], 256  }
  0x1c   :  { %823 = vsyncadd [#allocation3], 4294967040 }
  0x1d   :  { %824 = dma.done.wait [#allocation6], 512  }
  0x1e   :  { %825 = vsyncadd [#allocation6], 4294966784  ;;  %v836_v0 = vmov 0.0   ;;  %vm837_vm0 = vmmov 0   ;;  %vm89_vm1 = vcmask 1043456   ;;  %vm85_vm2 = vcmask 31744  }
  0x1f   :  { %635 = vmatprep.subr.mxu1 %v836_v0  ;;  %637 = vmatprep.mubr.msk.f32.mxu1 %vm837_vm0, %v836_v0  ;;  %v77_v1 = vld [vmem:[%s1020_s2] sm:$0xf]  ;;  %v165_v3 = vld [vmem:[#allocation2 + $0x8] sm:$0xff]  ;;  %vm173_vm3 = vcmask 130048   ;;  %v253_v6 = vld [vmem:[%s1024_s6 + $0x18] sm:$0xff]  ;;  %vm258_vm4 = vcmask 261120  }
  0x20   :  { %647 = vmatprep.subr.mxu0 %v836_v0  ;;  %655 = vmatprep.mubr.msk.f32.mxu0 %vm837_vm0, %v836_v0  ;;  %v76_v2 = vld [vmem:[%s1018_s0] sm:$0x3]  ;;  %v252_v7 = vld [vmem:[%s1024_s6 + $0x10] sm:$0xff]  ;;  %v257_v8 = vld [vmem:[#allocation5 + $0x18] sm:$0xff]  ;;  %vm247_vm5 = vcmask 254976   ;;  %vm503_vm6 = vcmask 25600  }
  0x21   :  { %636 = vmatpush3.msk.msra.mxu1 %vm89_vm1, %v77_v1  ;;  %v164_v4 = vld [vmem:[#allocation2] sm:$0xff]  ;;  %v251_v9 = vld [vmem:[%s1024_s6 + $0x8] sm:$0xff]  ;;  %648 = vmatpush3.msra.mxu0 %v257_v8  ;;  %v255_v12 = vld [vmem:[#allocation5 + $0x8] sm:$0xff] }
  0x22   :  { %638 = vmatmul.mubr.msk.f32.vlgmr.msra.gmra.mxu1 %vm85_vm2, %v76_v2  ;;  %640 = vmatprep.subr.mxu1 %v836_v0  ;;  %v163_v5 = vld [vmem:[%s1019_s1] sm:$0x3]  ;;  %v254_v13 = vld [vmem:[#allocation5] sm:$0xff]  ;;  %v417_v22 = vld [vmem:[%s1027_s9 + $0x18] sm:$0xff] }
  0x23   :  { %641 = vmatpush3.msra.mxu1 %v165_v3  ;;  %644 = vmatprep.mubr.msk.f32.mxu1 %vm837_vm0, %v836_v0  ;;  %v256_v10 = vld [vmem:[#allocation5 + $0x10] sm:$0xff]  ;;  %v416_v23 = vld [vmem:[%s1027_s9 + $0x10] sm:$0xff]  ;;  %v415_v24 = vld [vmem:[%s1027_s9 + $0x8] sm:$0xff] }
  0x24   :  { %642 = vmatprep.subr.mxu1 %v836_v0  ;;  %649 = vmatprep.subr.mxu0 %v836_v0  ;;  %v250_v11 = vld [vmem:[%s1024_s6] sm:$0xff] }
  0x25   :  { %643 = vmatpush3.msra.mxu1 %v164_v4  ;;  %650 = vmatpush3.msra.mxu0 %v256_v10  ;;  %v605_v14 = vld [vmem:[%s1021_s3] ss:$0 sm:$0xff] }
  0x26   :  { %645 = vmatmul.mubr.msk.f32.vlgmr.msra.gmra.mxu1 %vm173_vm3, %v163_v5  ;;  %658 = vmatprep.subr.mxu1 %v836_v0  ;;  %v608_v18 = vld [vmem:[%s1023_s5] ss:$0 sm:$0xff] }
  0x27   :  { %659 = vmatpush3.msra.mxu1 %v253_v6  ;;  %666 = vmatprep.mubr.msk.f32.mxu1 %vm837_vm0, %v836_v0  ;;  %v414_v25 = vld [vmem:[%s1027_s9] sm:$0xff] }
  0x28   :  { %660 = vmatprep.subr.mxu1 %v836_v0  ;;  %651 = vmatprep.subr.mxu0 %v836_v0  ;;  %v612_v29 = vld [vmem:[%s1026_s8] ss:$0 sm:$0xff] }
  0x29   :  { %661 = vmatpush3.msra.mxu1 %v252_v7  ;;  %652 = vmatpush3.msra.mxu0 %v255_v12  ;;  %v613_v34 = vld [vmem:[%s1028_s10] ss:$0 sm:$0xff]  ;;  %s838_s10 = smov [#allocation8]  }
  0x2a   :  { %662 = vmatprep.subr.mxu1 %v836_v0  ;;  %653 = vmatprep.subr.mxu0 %v836_v0  ;;  %v505_v57 = vld [vmem:[%s1029_s11] sm:$0x3]  ;;  %s564_s19 = sshll.u32 %s838_s10, 4  ;;  %s565_s19 = int_to_ptr.vmem [resolvable:$true] %s564_s19 }
  0x2b   :  { %663 = vmatpush3.msra.mxu1 %v251_v9  ;;  %654 = vmatpush3.msra.mxu0 %v254_v13  ;;  %v527_v63 = vsub.f32 1.0, %v505_v57  ;;  %s742_s0 = scalar_lea.vmem %s565_s19, 32  ;;  %p747_p11 = scmp.lt.s32.totalorder %s565_s19, %s565_s19 }
  0x2c   :  { %664 = vmatprep.subr.mxu1 %v836_v0  ;;  %669 = vmatprep.subr.mxu0 %v836_v0  ;;  %p743_p10 = scmp.ne.s32.totalorder %s565_s19, %s742_s0  ;;  %p748_p12 = scmp.lt.s32.totalorder %s742_s0, %s742_s0 }
  0x2d   :  { %665 = vmatpush3.msra.mxu1 %v250_v11 }
  0x2e   :  { %p749_p13 = por %p748_p12, %p747_p11 }
  0x30   :  { %p750_p0 = pnand %p749_p13, %p743_p10 }
  0xe2   :  { %v159_v15 = vpop.f32.mrf.mxu1 }
  0xe3   :  { %v160_v16 = vadd.f32 %v605_v14, %v159_v15 }
  0xe4   :  { %v639_v17 = vpop.f32.mrf.mxu1 }
  0xe5   :  { %667 = vmatmul.mubr.msk.f32.vlgmr.msra.gmra.mxu1 %vm258_vm4, %v160_v16  ;;  %248 = vst.msk [vmem:[#allocation10] sm:$0x3] %vm247_vm5, %v160_v16 }
  0xe6   :  { %v243_v19 = vpop.f32.mrf.mxu1 }
  0xe7   :  { %v244_v20 = vadd.f32 %v608_v18, %v243_v19 }
  0xe8   :  { %v646_v21 = vpop.f32.mrf.mxu1 }
  0xe9   :  { %656 = vmatmul.mubr.msk.f32.vlgmr.msra.gmra.mxu0 %vm258_vm4, %v244_v20  ;;  %249 = vst.msk [vmem:[#allocation11] sm:$0x3] %vm247_vm5, %v244_v20 }
  0xea   :  { %677 = vmatprep.mubr.msk.f32.mxu0 %vm837_vm0, %v836_v0  ;;  %670 = vmatpush3.msra.mxu0 %v417_v22 }
  0xeb   :  { %671 = vmatprep.subr.mxu0 %v836_v0 }
  0xec   :  { %672 = vmatpush3.msra.mxu0 %v416_v23 }
  0xed   :  { %673 = vmatprep.subr.mxu0 %v836_v0 }
  0xee   :  { %674 = vmatpush3.msra.mxu0 %v415_v24 }
  0xef   :  { %675 = vmatprep.subr.mxu0 %v836_v0 }
  0xf0   :  { %676 = vmatpush3.msra.mxu0 %v414_v25 }
 0x1a5   :  { %v401_v26 = vpop.f32.mrf.mxu1 }
 0x1a7   :  { %v668_v27 = vpop.f32.mrf.mxu1 }
 0x1a9   :  { %v328_v28 = vpop.f32.mrf.mxu0 }
 0x1aa   :  { %v402_v30 = vadd.f32 %v401_v26, %v328_v28 }
 0x1ab   :  { %v657_v31 = vpop.f32.mrf.mxu0 }
 0x1ac   :  { %v412_v32 = vadd.f32 %v612_v29, %v402_v30 }
 0x1ae   :  { %v413_v33 = vmax.f32 %v412_v32, 0.0 }
 0x1b0   :  { %678 = vmatmul.mubr.msk.f32.vlgmr.msra.gmra.mxu0 %vm258_vm4, %v413_v33 }
 0x270   :  { %v494_v35 = vpop.f32.mrf.mxu0 }
 0x271   :  { %v495_v36 = vadd.f32 %v613_v34, %v494_v35 }
 0x272   :  { %v679_v37 = vpop.f32.mrf.mxu0 }
 0x273   :  { %v498_v38 = vsub.f32 0.0, %v495_v36  ;;  %v507_v39 = vand.u32 2147483647, %v495_v36  ;;  %v506_v54 = vmin.f32 %v495_v36, 0.0 }
 0x275   :  { %v499_v40 = vmul.f32 1.442695, %v498_v38  ;;  %v508_v41 = vsub.f32 0.0, %v507_v39  ;;  %v517_v42 = vand.u32 2147483647, %v498_v38  ;;  %v516_v59 = vmin.f32 %v498_v38, 0.0 }
 0x277   :  { %690 = vpow2.f32 %v499_v40  ;;  %v509_v43 = vmul.f32 1.442695, %v508_v41  ;;  %v518_v44 = vsub.f32 0.0, %v517_v42 }
 0x279   :  { %692 = vpow2.f32 %v509_v43  ;;  %v519_v45 = vmul.f32 1.442695, %v518_v44 }
 0x27b   :  { %694 = vpow2.f32 %v519_v45 }
 0x284   :  { %v691_v46 = vpop.eup %690 }
 0x285   :  { %v501_v47 = vadd.f32 1.0, %v691_v46 }
 0x286   :  { %v693_v48 = vpop.eup %692 }
 0x287   :  { %696 = vrcp.f32 %v501_v47  ;;  %v511_v49 = vadd.f32 1.0, %v693_v48 }
 0x288   :  { %v695_v50 = vpop.eup %694 }
 0x289   :  { %698 = vlog2.f32 %v511_v49  ;;  %v521_v51 = vadd.f32 1.0, %v695_v50 }
 0x28b   :  { %700 = vlog2.f32 %v521_v51 }
 0x294   :  { %v697_v52 = vpop.eup %696 }
 0x295   :  { %504 = vst.msk [vmem:[#allocation8] sm:$0x3] %vm503_vm6, %v697_v52 }
 0x296   :  { %v699_v53 = vpop.eup %698 }
 0x297   :  { %v513_v55 = vmul.f32 0.6931472, %v699_v53 }
 0x298   :  { %v701_v56 = vpop.eup %700 }
 0x299   :  { %v514_v58 = vsub.f32 %v506_v54, %v513_v55  ;;  %v523_v60 = vmul.f32 0.6931472, %v701_v56 }
 0x29b   :  { %v515_v61 = vmax.f32 %v514_v58, -100.0  ;;  %v524_v62 = vsub.f32 %v516_v59, %v523_v60 }
 0x29d   :  { %v525_v0 = vmax.f32 %v524_v62, -100.0  ;;  %v526_v1 = vmul.f32 %v515_v61, %v505_v57 }
 0x29f   :  { %v528_v2 = vmul.f32 %v527_v63, %v525_v0 }
 0x2a1   :  { %v529_v3 = vadd.f32 %v528_v2, %v526_v1 }
 0x2a3   :  { %v530_v4 = vsub.f32 0.0, %v529_v3 }
 0x2a5   :  { %v531_v5 = vsel %vm503_vm6, %v530_v4, 0.0 }
 0x2a6   :  { %532 = vadd.xlane.f32.xlu0 %v531_v5 }
 0x2a7   :  { %753 = shalt.err (!%p750_p0)
}
 0x2a8   :  { %567 = dma.vmem_to_hbm [thread:$0]  %s565_s19, 32, %s1031_s13, [#allocation9]  }
 0x2a9   :  { %s839_s1 = smov [#allocation10]  }
 0x2aa   :  { %s574_s21 = sshll.u32 %s839_s1, 4  ;;  %s575_s21 = int_to_ptr.vmem [resolvable:$true] %s574_s21 }
 0x2ab   :  { %s762_s22 = scalar_lea.vmem %s575_s21, 32  ;;  %p767_p2 = scmp.lt.s32.totalorder %s575_s21, %s575_s21 }
 0x2ac   :  { %p763_p1 = scmp.ne.s32.totalorder %s575_s21, %s762_s22  ;;  %p768_p3 = scmp.lt.s32.totalorder %s762_s22, %s762_s22 }
 0x2ae   :  { %p769_p4 = por %p768_p3, %p767_p2 }
 0x2b0   :  { %p770_p5 = pnand %p769_p4, %p763_p1 }
 0x2b2   :  { %773 = shalt.err (!%p770_p5)
}
 0x2b3   :  { %577 = dma.vmem_to_hbm [thread:$0]  %s575_s21, 32, %s1032_s14, [#allocation9]  }
 0x2b4   :  { %s840_s25 = smov [#allocation11]  }
 0x2b5   :  { %s584_s6 = sshll.u32 %s840_s25, 4  ;;  %s585_s6 = int_to_ptr.vmem [resolvable:$true] %s584_s6 }
 0x2b6   :  { %s782_s26 = scalar_lea.vmem %s585_s6, 32  ;;  %p787_p7 = scmp.lt.s32.totalorder %s585_s6, %s585_s6 }
 0x2b7   :  { %p783_p6 = scmp.ne.s32.totalorder %s585_s6, %s782_s26  ;;  %p788_p8 = scmp.lt.s32.totalorder %s782_s26, %s782_s26 }
 0x2b9   :  { %p789_p9 = por %p788_p8, %p787_p7 }
 0x2bb   :  { %p790_p10 = pnand %p789_p9, %p783_p6 }
 0x2bd   :  { %793 = shalt.err (!%p790_p10)
}
 0x2be   :  { %587 = dma.vmem_to_hbm [thread:$0]  %s585_s6, 32, %s1033_s15, [#allocation12]   ;;  %vm536_vm7 = vcmask 1041408   ;;  %vm546_vm8 = vcmask 0  }
 0x2bf   :  { %s841_s14 = smov [#allocation7]  }
 0x2c0   :  { %s554_s27 = sshll.u32 %s841_s14, 4  ;;  %s555_s27 = int_to_ptr.vmem [resolvable:$true] %s554_s27 }
 0x2c1   :  { %s802_s5 = scalar_lea.vmem %s555_s27, 16  ;;  %s806_s28 = scalar_lea.vmem %s555_s27, 32 }
 0x2c2   :  { %p803_p11 = scmp.ne.s32.totalorder %s555_s27, %s802_s5  ;;  %p807_p12 = scmp.lt.s32.totalorder %s555_s27, %s555_s27 }
 0x2c3   :  { %p808_p13 = scmp.lt.s32.totalorder %s806_s28, %s802_s5 }
 0x2c5   :  { %p809_p0 = por %p808_p13, %p807_p12 }
 0x2c7   :  { %p810_p1 = pnand %p809_p0, %p803_p11 }
 0x32f   :  { %v533_v6 = vpop.xlane.xlu0 %532 }
 0x330   :  { %v535_v7 = vmul.f32 0.25, %v533_v6 }
 0x332   :  { %v537_v8 = vsel %vm536_vm7, %v535_v7, 0.0 }
 0x333   :  { %v538_v9 = vrot.slane %v537_v8, 4 }
 0x335   :  { %v539_v10 = vadd.f32 %v538_v9, %v537_v8 }
 0x337   :  { %v540_v11 = vrot.slane %v539_v10, 2 }
 0x339   :  { %v541_v12 = vadd.f32 %v540_v11, %v539_v10 }
 0x33b   :  { %v542_v13 = vrot.slane %v541_v12, 1 }
 0x33d   :  { %v543_v14 = vadd.f32 %v542_v13, %v541_v12 }
 0x33f   :  { %v545_v15 = vmul.f32 0.5, %v543_v14 }
 0x341   :  { %547 = vst.msk [vmem:[#allocation7] sm:$0x1] %vm546_vm8, %v545_v15 }
 0x342   :  { %813 = shalt.err (!%p810_p1)
}
 0x343   :  { %557 = dma.vmem_to_hbm [thread:$0]  %s555_s27, 16, %s1030_s12, [#allocation4]  }
 0x344   :  { %826 = dma.done.wait [#allocation4], 16  }
 0x345   :  { %827 = vsyncadd [#allocation4], 4294967280 }
 0x346   :  { %828 = dma.done.wait [#allocation9], 64  }
 0x347   :  { %829 = vsyncadd [#allocation9], 4294967232 }
 0x348   :  { %830 = dma.done.wait [#allocation12], 32  }
 0x349   :  { %831 = vsyncadd [#allocation12], 4294967264 }
 0x34a   :  { %600 = vsyncpa [#allocation3], 1 }
 0x34b   :  { %601 = vsyncpa [#allocation6], 1 }
 0x34c   :  { %602 = vsyncpa [#allocation4], 1 }
 0x34d   :  { %603 = vsyncpa [#allocation9], 1 }
 0x34e   :  { %604 = vsyncpa [#allocation12], 1 }

</bundles_post_ra>
